<compile_context>
chip_gen: v5e
topology: v5e:2x2
jax: 0.10.0
libtpu: 0.0.40
codegen_flags: <defaults>
</compile_context>

<pallas_src>
import jax
import jax.numpy as jnp
from jax.experimental import pallas as pl
from jax.experimental.pallas import tpu as pltpu


DIM_EMB = 64
HIDDEN = DIM_EMB // 8          # 8
NUM_REFERENCES = 100
OUTPUT_DIM = 1
_NEG_INF = -1e30


def _ban_kernel(q_ref, wbig_ref, pvext_ref, bias_ref, scal_ref, out_ref):
    # q:     (QBLK, C)        bf16 query embeddings (padded rows are don't-care)
    # wbig:  (C, 2*NPAD)      bf16 fused [energy | identity | fcW] weight
    # pvext: (NPAD, NPAD)     bf16 fused [proj_v | proj_v@fcW | 0]
    # bias:  (1, NPAD)        f32  bq@proj_kT + additive -1e30 pad mask
    # scal:  (3,) SMEM        f32  [gamma, alpha, fc_bias]
    # out:   (QBLK, NPAD)     f32  lanes 0..C-1 = emb2, lane C = Y_prob
    npad = bias_ref.shape[1]
    c = q_ref.shape[1]

    q = q_ref[...]                                                            # (QBLK, C) bf16

    # Single fused q-side matmul: energy pre-bias, q copy, and q@fcW at once.
    qw = jnp.dot(q, wbig_ref[...], preferred_element_type=jnp.float32)        # (QBLK, 2*NPAD)

    # ---- softmax over references (padded refs masked to -1e30) -------------
    energy = qw[:, :npad] + bias_ref[...]                                     # (QBLK, NPAD)
    energy = energy - jnp.max(energy, axis=-1, keepdims=True)
    p = jnp.exp(energy)
    attn = p * pl.reciprocal(jnp.sum(p, axis=-1, keepdims=True), approx=False)

    # ---- attention @ [proj_v | proj_v@fcW | 0] ------------------------------
    att_ext = jnp.dot(attn.astype(pvext_ref.dtype), pvext_ref[...],
                      preferred_element_type=jnp.float32)                     # (QBLK, NPAD)

    # q-side extension already in the same lane layout: lanes 0..C-1 = q,
    # lane C = q@fcW, rest 0.
    q_ext = qw[:, npad:]                                                      # (QBLK, NPAD)

    gamma = scal_ref[0]
    alpha = scal_ref[1]
    fcb = scal_ref[2]

    # lanes 0..C-1 = emb2 = gamma*att_out + alpha*q ; lane C = logit - fcb
    emb2_ext = gamma * att_ext + alpha * q_ext                                # (QBLK, NPAD)

    # fc head epilogue (pure VPU/EUP, no extra matmul): sigmoid on all lanes
    # (EUP has slack), keep it only where lane >= C via iota select.
    y_all = pl.reciprocal(1.0 + jnp.exp(-(emb2_ext + fcb)), approx=False)
    y_all = jnp.clip(y_all, 1e-5, 1.0 - 1e-5)

    lane = jax.lax.broadcasted_iota(jnp.int32, emb2_ext.shape, dimension=1)
    out_ref[...] = jnp.where(lane < c, emb2_ext, y_all)


def prepare_references(tr_bags, params):
    """Query-independent precompute: run ONCE per (reference set, params)."""
    tr = jnp.stack(tr_bags, axis=0).astype(jnp.float32)          # (N, C) stacked once
    n, c = tr.shape
    npad = max(128, ((n + 127) // 128) * 128)                    # lane-align reference dim
    tr_pad = jnp.zeros((npad, c), jnp.float32).at[:n, :].set(tr)

    proj_k = tr_pad @ params["wkT"] + params["bk"]               # (NPAD, H)
    proj_v = tr_pad @ params["wvT"] + params["bv"]               # (NPAD, C)

    # Fused q-side weight: [ WqT @ proj_kT | I_C | fcW | 0 ]  ->  (C, 2*NPAD)
    wqk = params["wqT"] @ proj_k.T                               # (C, NPAD)
    w_big = jnp.zeros((c, 2 * npad), jnp.float32)
    w_big = w_big.at[:, :npad].set(wqk)
    w_big = w_big.at[:, npad:npad + c].set(jnp.eye(c, dtype=jnp.float32))
    w_big = w_big.at[:, npad + c].set(params["fcwT"][:, 0])

    # Bias + mask row: bq folded into the energy; -1e30 on padded reference rows.
    bias = params["bq"] @ proj_k.T                               # (1, NPAD)
    mask = jnp.where(jnp.arange(npad) < n, 0.0, _NEG_INF)[None, :]
    bias_mask = (bias + mask).astype(jnp.float32)

    # Extended values: [ proj_v | proj_v @ fcW | 0 ]  ->  (NPAD, NPAD)
    pv_ext = jnp.zeros((npad, npad), jnp.float32)
    pv_ext = pv_ext.at[:, :c].set(proj_v)
    pv_ext = pv_ext.at[:, c].set((proj_v @ params["fcwT"])[:, 0])

    # [gamma, alpha, fc_bias] packed into a single SMEM scalar array.
    scalars = jnp.concatenate(
        [params["gamma_alpha"], params["fcb"].reshape(-1)]).astype(jnp.float32)

    return {
        "w_big": w_big.astype(jnp.bfloat16),                     # (C, 2*NPAD)
        "pv_ext": pv_ext.astype(jnp.bfloat16),                   # (NPAD, NPAD)
        "bias_mask": bias_mask,                                  # (1, NPAD) f32
        "scalars": scalars,                                      # (3,) f32
    }


def _choose_qblk(n_q):
    """Sublane-aligned query block; >= 2 grid steps when n_q > 8 (v7x megacore)."""
    if n_q <= 8:
        return 8
    half = -(-n_q // 2)                                          # cdiv(n_q, 2)
    return min(512, ((half + 7) // 8) * 8)


def ban_attention_head(q_batch, fused):
    """SelfAttention + fc head for a batch of query embeddings (Q, C)."""
    q_batch = q_batch.astype(jnp.float32)
    n_q, c = q_batch.shape
    npad = fused["pv_ext"].shape[0]

    qblk = _choose_qblk(n_q)
    qpad = ((n_q + qblk - 1) // qblk) * qblk
    q_pad = (jnp.zeros((qpad, c), jnp.float32)
             .at[:n_q, :].set(q_batch)
             .astype(jnp.bfloat16))                              # halve q DMA bytes

    grid = (qpad // qblk,)

    out = pl.pallas_call(
        _ban_kernel,
        out_shape=jax.ShapeDtypeStruct((qpad, npad), jnp.float32),
        grid=grid,
        in_specs=[
            pl.BlockSpec((qblk, c), lambda i: (i, 0)),            # q (blocked over queries)
            pl.BlockSpec((c, 2 * npad), lambda i: (0, 0)),        # fused w_big
            pl.BlockSpec((npad, npad), lambda i: (0, 0)),         # fused pv_ext
            pl.BlockSpec((1, npad), lambda i: (0, 0)),            # bias + mask row
            pl.BlockSpec(memory_space=pltpu.MemorySpace.SMEM),    # [gamma, alpha, fcb]
        ],
        out_specs=pl.BlockSpec((qblk, npad), lambda i: (i, 0)),
        compiler_params=pltpu.CompilerParams(
            dimension_semantics=("parallel",)),
    )(q_pad, fused["w_big"], fused["pv_ext"], fused["bias_mask"], fused["scalars"])

    emb2 = out[:n_q, :DIM_EMB]                                   # (Q, C)
    yprob = out[:n_q, DIM_EMB]                                   # (Q,)
    return yprob, emb2


def ban_forward(x, fused, params):
    """Full BAN.forward for one query bag (tr_mask is unused by the reference forward)."""
    # TODO(synk): the real base_model is an external frozen network; stand-in
    # here is a deterministic mean-pool + linear producing the (1, 64) embedding.
    # For throughput, callers should batch many query embeddings and call
    # ban_attention_head once (single dispatch) rather than per-query.
    emb_q = jnp.mean(x, axis=0) @ params["base_w"] + params["base_b"]    # (64,)
    emb_q = emb_q[None, :].astype(jnp.float32)                           # (1, 64)

    yprob, emb2 = ban_attention_head(emb_q, fused)
    y_prob = yprob[0]                                                    # .squeeze() -> scalar
    return y_prob, emb2[:1]                                              # emb2: (1, 64)


def init_params(key, input_dim):
    ks = jax.random.split(key, 8)
    scale = 0.1
    p = {
        # stand-in base model: input_dim -> dim_emb
        "base_w": scale * jax.random.normal(ks[0], (input_dim, DIM_EMB), jnp.float32),
        "base_b": scale * jax.random.normal(ks[1], (DIM_EMB,), jnp.float32),
        # SelfAttention Conv1d(k=1) weights, stored pre-transposed (C_in, C_out)
        "wqT": scale * jax.random.normal(ks[2], (DIM_EMB, HIDDEN), jnp.float32),
        "bq": scale * jax.random.normal(ks[3], (1, HIDDEN), jnp.float32),
        "wkT": scale * jax.random.normal(ks[4], (DIM_EMB, HIDDEN), jnp.float32),
        "bk": scale * jax.random.normal(ks[5], (1, HIDDEN), jnp.float32),
        "wvT": scale * jax.random.normal(ks[6], (DIM_EMB, DIM_EMB), jnp.float32),
        "bv": scale * jax.random.normal(ks[7], (1, DIM_EMB), jnp.float32),
        # fc: dim_emb -> output_dim (pre-transposed)
        "fcwT": scale * jax.random.normal(jax.random.fold_in(key, 100),
                                          (DIM_EMB, OUTPUT_DIM), jnp.float32),
        "fcb": scale * jax.random.normal(jax.random.fold_in(key, 101),
                                         (1, OUTPUT_DIM), jnp.float32),
        # [gamma, alpha] exactly as in __init__: zeros(1) and tensor(2.0)
        "gamma_alpha": jnp.array([0.0, 2.0], jnp.float32),
    }
    return p


if __name__ == "__main__":
    key = jax.random.PRNGKey(0)
    k_x, k_bags, k_params, k_batch = jax.random.split(key, 4)

    input_dim = 32
    num_instances = 12

    # bag of instances fed to the (stand-in) base model
    x = jax.random.normal(k_x, (num_instances, input_dim), jnp.float32)
    # list of reference-bag embeddings (each dim_emb=64), as in `torch.stack(tr_bags)`
    bag_keys = jax.random.split(k_bags, NUM_REFERENCES)
    tr_bags = [jax.random.normal(bk, (DIM_EMB,), jnp.float32) for bk in bag_keys]

    params = init_params(k_params, input_dim)

    # one-time, query-independent precompute of fused reference/weight operands
    fused = prepare_references(tr_bags, params)
    jax.block_until_ready(fused)

    # single-query BAN.forward (matches the PyTorch module semantics)
    y_prob, emb2 = ban_forward(x, fused, params)
    jax.block_until_ready((y_prob, emb2))
    assert emb2.shape == (1, DIM_EMB)
    assert y_prob.shape == ()
    assert bool(jnp.isfinite(y_prob)) and 0.0 < float(y_prob) < 1.0

    # batched-query path (exercises a >=2-step "parallel" grid: both v7x TCs)
    q_batch = jax.random.normal(k_batch, (16, DIM_EMB), jnp.float32)
    yb, eb = ban_attention_head(q_batch, fused)
    jax.block_until_ready((yb, eb))
    assert eb.shape == (16, DIM_EMB) and yb.shape == (16,)
    assert bool(jnp.all(jnp.isfinite(yb)))
    assert bool(jnp.all((yb > 0.0) & (yb < 1.0)))

    print("KERNEL_OK")
</pallas_src>

<mosaic_0001>
module attributes {stable_mosaic.version = 11 : i64} {
  func.func @_ban_kernel(%arg0: i32, %arg1: memref<8x64xbf16, #tpu.memory_space<vmem>>, %arg2: memref<64x256xbf16, #tpu.memory_space<vmem>>, %arg3: memref<128x128xbf16, #tpu.memory_space<vmem>>, %arg4: memref<1x128xf32, #tpu.memory_space<vmem>>, %arg5: memref<3xf32, #tpu.memory_space<smem>>, %arg6: memref<8x128xf32, #tpu.memory_space<vmem>>) attributes {dimension_semantics = [#tpu.dimension_semantics<parallel>], iteration_bounds = array<i64: 1>, scalar_prefetch = 0 : i64, scratch_operands = 0 : i64, tpu.core_type = #tpu.core_type<tc>, window_params = [{transform_indices = @transform_0, window_bounds = array<i64: 8, 64>}, {pipeline_mode = #tpu.pipeline_mode<synchronous>, transform_indices = @transform_1, window_bounds = array<i64: 64, 256>}, {pipeline_mode = #tpu.pipeline_mode<synchronous>, transform_indices = @transform_2, window_bounds = array<i64: 128, 128>}, {pipeline_mode = #tpu.pipeline_mode<synchronous>, transform_indices = @transform_3, window_bounds = array<i64: 1, 128>}, {transform_indices = @transform_4, window_bounds = array<i64: 3>}, {transform_indices = @transform_5, window_bounds = array<i64: 8, 128>}]} {
    %c0 = arith.constant 0 : index
    %c0_0 = arith.constant 0 : index
    %0 = vector.load %arg1[%c0, %c0_0] : memref<8x64xbf16, #tpu.memory_space<vmem>>, vector<8x64xbf16>
    %c0_1 = arith.constant 0 : index
    %c0_2 = arith.constant 0 : index
    %1 = vector.load %arg2[%c0_1, %c0_2] : memref<64x256xbf16, #tpu.memory_space<vmem>>, vector<64x256xbf16>
    %cst = arith.constant dense<0.000000e+00> : vector<8x256xf32>
    %2 = tpu.matmul %0, %1, %cst {dimension_numbers = #tpu.dot_dimension_numbers<[1], [0], [0], [1], [0, 0, 1, 1], [], []>} : vector<8x64xbf16>, vector<64x256xbf16>, vector<8x256xf32> -> vector<8x256xf32>
    %3 = vector.extract_strided_slice %2 {offsets = [0, 0], sizes = [8, 128], strides = [1, 1]} : vector<8x256xf32> to vector<8x128xf32>
    %c0_3 = arith.constant 0 : index
    %c0_4 = arith.constant 0 : index
    %4 = vector.load %arg4[%c0_3, %c0_4] : memref<1x128xf32, #tpu.memory_space<vmem>>, vector<1x128xf32>
    %5 = vector.broadcast %4 : vector<1x128xf32> to vector<8x128xf32>
    %6 = arith.addf %3, %5 : vector<8x128xf32>
    %cst_5 = arith.constant dense<0xFF800000> : vector<8xf32>
    %7 = vector.multi_reduction <maximumf>, %6, %cst_5 [1] : vector<8x128xf32> to vector<8xf32>
    %8 = vector.shape_cast %7 : vector<8xf32> to vector<8x1xf32>
    %9 = vector.broadcast %8 : vector<8x1xf32> to vector<8x128xf32>
    %10 = arith.subf %6, %9 : vector<8x128xf32>
    %11 = math.exp %10 : vector<8x128xf32>
    %cst_6 = arith.constant dense<0.000000e+00> : vector<8xf32>
    %12 = vector.multi_reduction <add>, %11, %cst_6 [1] : vector<8x128xf32> to vector<8xf32>
    %13 = vector.shape_cast %12 : vector<8xf32> to vector<8x1xf32>
    %14 = tpu.reciprocal %13 : vector<8x1xf32> -> vector<8x1xf32>
    %15 = vector.broadcast %14 : vector<8x1xf32> to vector<8x128xf32>
    %16 = arith.mulf %11, %15 : vector<8x128xf32>
    %17 = arith.truncf %16 : vector<8x128xf32> to vector<8x128xbf16>
    %c0_7 = arith.constant 0 : index
    %c0_8 = arith.constant 0 : index
    %18 = vector.load %arg3[%c0_7, %c0_8] : memref<128x128xbf16, #tpu.memory_space<vmem>>, vector<128x128xbf16>
    %cst_9 = arith.constant dense<0.000000e+00> : vector<8x128xf32>
    %19 = tpu.matmul %17, %18, %cst_9 {dimension_numbers = #tpu.dot_dimension_numbers<[1], [0], [0], [1], [0, 0, 1, 1], [], []>} : vector<8x128xbf16>, vector<128x128xbf16>, vector<8x128xf32> -> vector<8x128xf32>
    %20 = vector.extract_strided_slice %2 {offsets = [0, 128], sizes = [8, 128], strides = [1, 1]} : vector<8x256xf32> to vector<8x128xf32>
    %c0_10 = arith.constant 0 : index
    %21 = memref.load %arg5[%c0_10] : memref<3xf32, #tpu.memory_space<smem>>
    %c1 = arith.constant 1 : index
    %22 = memref.load %arg5[%c1] : memref<3xf32, #tpu.memory_space<smem>>
    %c2 = arith.constant 2 : index
    %23 = memref.load %arg5[%c2] : memref<3xf32, #tpu.memory_space<smem>>
    %24 = vector.broadcast %21 : f32 to vector<8x128xf32>
    %25 = arith.mulf %24, %19 : vector<8x128xf32>
    %26 = vector.broadcast %22 : f32 to vector<8x128xf32>
    %27 = arith.mulf %26, %20 : vector<8x128xf32>
    %28 = arith.addf %25, %27 : vector<8x128xf32>
    %29 = vector.broadcast %23 : f32 to vector<8x128xf32>
    %30 = arith.addf %28, %29 : vector<8x128xf32>
    %cst_11 = arith.constant 0.000000e+00 : f32
    %31 = vector.broadcast %cst_11 : f32 to vector<8x128xf32>
    %32 = arith.subf %31, %30 : vector<8x128xf32>
    %33 = math.exp %32 : vector<8x128xf32>
    %cst_12 = arith.constant 1.000000e+00 : f32
    %34 = vector.broadcast %cst_12 : f32 to vector<8x128xf32>
    %35 = arith.addf %34, %33 : vector<8x128xf32>
    %36 = tpu.reciprocal %35 : vector<8x128xf32> -> vector<8x128xf32>
    %cst_13 = arith.constant 9.99999974E-6 : f32
    %cst_14 = arith.constant 0.999989986 : f32
    %37 = vector.broadcast %cst_13 : f32 to vector<8x128xf32>
    %38 = arith.maximumf %37, %36 : vector<8x128xf32>
    %39 = vector.broadcast %cst_14 : f32 to vector<8x128xf32>
    %40 = arith.minimumf %39, %38 : vector<8x128xf32>
    %41 = tpu.iota {dimensions = array<i32: 1>} : vector<8x128xi32>
    %c64_i32 = arith.constant 64 : i32
    %42 = vector.broadcast %c64_i32 : i32 to vector<8x128xi32>
    %43 = arith.cmpi slt, %41, %42 : vector<8x128xi32>
    %44 = arith.select %43, %28, %40 : vector<8x128xi1>, vector<8x128xf32>
    %c0_15 = arith.constant 0 : index
    %c0_16 = arith.constant 0 : index
    %45 = vector.load %arg6[%c0_15, %c0_16] : memref<8x128xf32, #tpu.memory_space<vmem>>, vector<8x128xf32>
    tpu.vector_store %arg6[%c0_15, %c0_16], %44 {strides = array<i32>} : memref<8x128xf32, #tpu.memory_space<vmem>>, vector<8x128xf32>,
    return
  }
  func.func @transform_0(%arg0: i32) -> (i32, i32) {
    %c0_i32 = arith.constant 0 : i32
    %c0_i32_0 = arith.constant 0 : i32
    return %arg0, %c0_i32 : i32, i32
  }
  func.func @transform_1(%arg0: i32) -> (i32, i32) {
    %c0_i32 = arith.constant 0 : i32
    %c0_i32_0 = arith.constant 0 : i32
    %c0_i32_1 = arith.constant 0 : i32
    return %c0_i32, %c0_i32_0 : i32, i32
  }
  func.func @transform_2(%arg0: i32) -> (i32, i32) {
    %c0_i32 = arith.constant 0 : i32
    %c0_i32_0 = arith.constant 0 : i32
    %c0_i32_1 = arith.constant 0 : i32
    return %c0_i32, %c0_i32_0 : i32, i32
  }
  func.func @transform_3(%arg0: i32) -> (i32, i32) {
    %c0_i32 = arith.constant 0 : i32
    %c0_i32_0 = arith.constant 0 : i32
    %c0_i32_1 = arith.constant 0 : i32
    return %c0_i32, %c0_i32_0 : i32, i32
  }
  func.func @transform_4(%arg0: i32) -> i32 {
    %c0_i32 = arith.constant 0 : i32
    %c0_i32_0 = arith.constant 0 : i32
    return %c0_i32 : i32
  }
  func.func @transform_5(%arg0: i32) -> (i32, i32) {
    %c0_i32 = arith.constant 0 : i32
    %c0_i32_0 = arith.constant 0 : i32
    return %arg0, %c0_i32 : i32, i32
  }
}

</mosaic_0001>

<bundles_post_ra>
// kernel: tpu_custom_call.1
= control target key start
LH: loop header
LB: loop body
LE: loop exit
PB: predicated region body
PF: predicated region fallthrough
CT: control target
= control target key end

     0   :  { %10 = vsyncpa [#allocation3], 0  ;;  %s595_s0 = inlined_call_operand.hbm [shape: bf16[8,64], index: 0, kind: input, shape index: {}]   ;;  %s596_s1 = inlined_call_operand.hbm [shape: bf16[64,256], index: 1, kind: input, shape index: {}]   ;;  %s597_s2 = inlined_call_operand.hbm [shape: bf16[128,128], index: 2, kind: input, shape index: {}]   ;;  %s598_s3 = inlined_call_operand.vmem [shape: f32[1,128], index: 3, kind: input, shape index: {}]   ;;  %s599_s4 = inlined_call_operand.vmem [shape: f32[3], index: 4, kind: input, shape index: {}]   ;;  %s600_s5 = inlined_call_operand.hbm [shape: f32[8,128], index: 5, kind: output, shape index: {}]  }
   0x1   :  { %11 = vsyncpa [#allocation7], 0 }
   0x2   :  { %12 = vsyncpa [#allocation5], 0  ;;  %s29_s20 = sshll.u32 %s596_s1, 4  ;;  %s30_s20 = int_to_ptr.hbm [resolvable:$true] %s29_s20 }
   0x3   :  { %13 = vsyncpa [#allocation4], 0  ;;  %s536_s21 = smov [#allocation6]   ;;  %s19_s25 = sshll.u32 %s595_s0, 4  ;;  %s20_s25 = int_to_ptr.hbm [resolvable:$true] %s19_s25 }
   0x4   :  { %s31_s22 = sshll.u32 %s536_s21, 4  ;;  %s537_s26 = smov 128   ;;  %s32_s22 = int_to_ptr.vmem [resolvable:$true] %s31_s22 }
   0x5   :  { %s538_s27 = smov 8   ;;  %s539_s28 = smov [#allocation2]  }
   0x6   :  { %37 = dma.hbm_to_vmem [thread:$0]  %s30_s20, 1024, %s32_s22, [#allocation7], %s537_s26, %s537_s26, %s538_s27  }
   0x7   :  { %s21_s29 = sshll.u32 %s539_s28, 4  ;;  %s42_s7 = sshll.u32 %s597_s2, 4  ;;  %s22_s29 = int_to_ptr.vmem [resolvable:$true] %s21_s29  ;;  %s43_s7 = int_to_ptr.hbm [resolvable:$true] %s42_s7 }
   0x8   :  { %24 = dma.hbm_to_vmem [thread:$0]  %s20_s25, 64, %s22_s29, [#allocation3]  }
   0x9   :  { %s540_s1 = smov [#allocation8]   ;;  %s58_s0 = sshll.u32 %s599_s4, 4  ;;  %s59_s0 = int_to_ptr.vmem [resolvable:$true] %s58_s0 }
   0xa   :  { %s44_s8 = sshll.u32 %s540_s1, 4  ;;  %s541_s11 = smov 64   ;;  %s45_s8 = int_to_ptr.vmem [resolvable:$true] %s44_s8 }
   0xb   :  { %s542_s12 = smov 4   ;;  %s543_s13 = smov [#allocation9]  }
   0xc   :  { %50 = dma.hbm_to_vmem [thread:$0]  %s43_s7, 1024, %s45_s8, [#allocation7], %s541_s11, %s541_s11, %s542_s12  }
   0xd   :  { %61 = dma.vmem_to_smem %s59_s0, 16, %s543_s13, [#allocation5]  }
   0xe   :  { %528 = dma.done.wait [#allocation3], 64  }
   0xf   :  { %529 = vsyncadd [#allocation3], 4294967232 }
  0x10   :  { %530 = dma.done.wait [#allocation7], 2048  }
  0x11   :  { %531 = vsyncadd [#allocation7], 4294965248 }
  0x12   :  { %532 = dma.done.wait [#allocation5], 16  }
  0x13   :  { %533 = vsyncadd [#allocation5], 4294967280 }
  0x14   :  { %78 = sfence }
  0x15   :  { %v344_v0 = vld [vmem:[#allocation6 + $0x30] sm:$0xf]  ;;  %v393_v1 = vld [vmem:[#allocation6 + $0x34] sm:$0xf0]  ;;  %v336_v2 = vld [vmem:[#allocation6 + $0x20] sm:$0xf] }
  0x16   :  { %v345_v3 = vor.u32 %v393_v1, %v344_v0  ;;  %v391_v4 = vld [vmem:[#allocation6 + $0x24] sm:$0xf0]  ;;  %v328_v6 = vld [vmem:[#allocation6 + $0x10] sm:$0xf]  ;;  %v389_v7 = vld [vmem:[#allocation6 + $0x14] sm:$0xf0] }
  0x17   :  { %v337_v5 = vor.u32 %v391_v4, %v336_v2  ;;  %v329_v8 = vor.u32 %v389_v7, %v328_v6  ;;  %v320_v9 = vld [vmem:[#allocation6] sm:$0xf]  ;;  %v387_v10 = vld [vmem:[#allocation6 + $0x4] sm:$0xf0]  ;;  %v80_v12 = vld [vmem:[#allocation2] sm:$0xf] }
  0x18   :  { %137 = vmatpush.bf16.msra.mxu0 %v345_v3  ;;  %v321_v11 = vor.u32 %v387_v10, %v320_v9  ;;  %vm129_vm0 = vcmask 523264   ;;  %v411_v13 = vld [vmem:[%s598_s3] ss:$0 sm:$0xff]  ;;  %v400_v18 = vld [vmem:[#allocation8 + $0x30] sm:$0xff]  ;;  %v399_v19 = vld [vmem:[#allocation8 + $0x28] sm:$0xff]  ;;  %s384_s3 = sld [smem:[#allocation9 + $0x1]]  ;;  %v294_v9 = vlaneseq }
  0x19   :  { %v401_v17 = vld [vmem:[#allocation8 + $0x38] sm:$0xff]  ;;  %v398_v24 = vld [vmem:[#allocation8 + $0x20] sm:$0xff]  ;;  %v392_v25 = vld [vmem:[#allocation6 + $0x34] sm:$0xf]  ;;  %s264_s14 = sld [smem:[#allocation9]]  ;;  %s544_s16 = smov [#allocation10]  }
  0x1a   :  { %251 = vmatpush.bf16.msra.mxu2 %v401_v17  ;;  %v346_v26 = vld [vmem:[#allocation6 + $0x38] sm:$0xf0]  ;;  %v390_v29 = vld [vmem:[#allocation6 + $0x24] sm:$0xf]  ;;  %v338_v30 = vld [vmem:[#allocation6 + $0x28] sm:$0xf0] }
  0x1b   :  { %v349_v27 = vor.u32 %v392_v25, %v346_v26  ;;  %v397_v28 = vld [vmem:[#allocation8 + $0x18] sm:$0xff]  ;;  %v341_v31 = vor.u32 %v390_v29, %v338_v30  ;;  %v396_v32 = vld [vmem:[#allocation8 + $0x10] sm:$0xff]  ;;  %v395_v36 = vld [vmem:[#allocation8 + $0x8] sm:$0xff]  ;;  %s385_s15 = sld [smem:[#allocation9 + $0x2]]  ;;  %s304_s17 = sshll.u32 %s544_s16, 4  ;;  %s305_s17 = int_to_ptr.vmem [resolvable:$true] %s304_s17 }
  0x1c   :  { %138 = vmatpush.bf16.msra.mxu0 %v337_v5  ;;  %v388_v33 = vld [vmem:[#allocation6 + $0x14] sm:$0xf]  ;;  %v330_v34 = vld [vmem:[#allocation6 + $0x18] sm:$0xf0]  ;;  %v386_v37 = vld [vmem:[#allocation6 + $0x4] sm:$0xf] }
  0x1d   :  { %150 = vmatpush.bf16.msra.mxu1 %v349_v27  ;;  %v333_v35 = vor.u32 %v388_v33, %v330_v34  ;;  %v322_v38 = vld [vmem:[#allocation6 + $0x8] sm:$0xf0]  ;;  %v394_v40 = vld [vmem:[#allocation8] sm:$0xff]  ;;  %s306_s20 = sshll.u32 %s600_s5, 4  ;;  %s307_s20 = int_to_ptr.hbm [resolvable:$true] %s306_s20 }
  0x1e   :  { %252 = vmatpush.bf16.msra.mxu2 %v400_v18  ;;  %v325_v39 = vor.u32 %v386_v37, %v322_v38  ;;  %v269_v56 = vstv %s384_s3 }
  0x1f   :  { %v267_v57 = vstv %s264_s14 }
  0x20   :  { %139 = vmatpush.bf16.msra.mxu0 %v329_v8 }
  0x21   :  { %151 = vmatpush.bf16.msra.mxu1 %v341_v31  ;;  %v272_v61 = vstv %s385_s15 }
  0x22   :  { %253 = vmatpush.bf16.msra.mxu2 %v399_v19 }
  0x24   :  { %140 = vmatpush.bf16.msra.mxu0 %v321_v11 }
  0x25   :  { %152 = vmatpush.bf16.msra.mxu1 %v333_v35 }
  0x26   :  { %254 = vmatpush.bf16.msra.mxu2 %v398_v24 }
  0x27   :  { %350 = vmatmul.msk.bf16.vlgmr.msra.gmra.mxu0 %vm129_vm0, %v80_v12 }
  0x29   :  { %153 = vmatpush.bf16.msra.mxu1 %v325_v39 }
  0x2a   :  { %255 = vmatpush.bf16.msra.mxu2 %v397_v28 }
  0x2c   :  { %351 = vmatmul.msk.bf16.vlgmr.msra.gmra.mxu1 %vm129_vm0, %v80_v12 }
  0x2e   :  { %256 = vmatpush.bf16.msra.mxu2 %v396_v32 }
  0x32   :  { %257 = vmatpush.bf16.msra.mxu2 %v395_v36 }
  0x36   :  { %258 = vmatpush.bf16.msra.mxu2 %v394_v40 }
  0xa4   :  { %v142_v14 = vpop.f32.mrf.mxu0 }
  0xa5   :  { %v163_v15 = vadd.f32 %v411_v13, %v142_v14  ;;  %v295_v14 = vand.u32 127, %v294_v9 }
  0xa7   :  { %164 = vmax.xlane.f32.xlu0 %v163_v15  ;;  %vm296_vm9 = vcmp.lt.s32.totalorder %v295_v14, 64 }
  0xa9   :  { %v155_v54 = vpop.f32.mrf.mxu1 }
  0xaa   :  { %v270_v58 = vmul.f32 %v269_v56, %v155_v54 }
  0xac   :  { %v144_v16 = vpop.f32.mrf.mxu0 }
  0xb1   :  { %v157_v55 = vpop.f32.mrf.mxu1 }
 0x11a   :  { %v165_v20 = vpop.xlane.xlu0 %164 }
 0x11b   :  { %v166_v21 = vsub.f32 %v163_v15, %v165_v20 }
 0x11d   :  { %v167_v22 = vmul.f32 1.442695, %v166_v21 }
 0x11f   :  { %412 = vpow2.f32 %v167_v22 }
 0x125   :  { %v413_v23 = vpop.eup %412 }
 0x126   :  { %169 = vadd.xlane.f32.xlu0 %v413_v23 }
 0x199   :  { %v170_v41 = vpop.xlane.xlu0 %169 }
 0x19a   :  { %414 = vrcp.f32 %v170_v41  ;;  %v182_v45 = vand.u32 2147483648, %v170_v41  ;;  %v180_v47 = vand.u32 2147483647, %v170_v41  ;;  %vm176_vm2 = vweird.f32 %v170_v41 }
 0x19c   :  { %v183_v49 = vor.u32 1.1754944e-38, %v182_v45  ;;  %vm181_vm4 = vcmp.eq.f32.partialorder %v180_v47, 8.507059e+37 }
 0x1a0   :  { %v415_v42 = vpop.eup %414 }
 0x1a1   :  { %v172_v43 = vmul.f32 %v415_v42, %v170_v41  ;;  %vm177_vm1 = vweird.f32 %v415_v42 }
 0x1a2   :  { %vm178_vm3 = vmor %vm176_vm2, %vm177_vm1 }
 0x1a3   :  { %v173_v44 = vsub.f32 1.0, %v172_v43 }
 0x1a5   :  { %v174_v46 = vmul.f32 %v415_v42, %v173_v44 }
 0x1a7   :  { %v175_v48 = vadd.f32 %v415_v42, %v174_v46 }
 0x1a9   :  { %v179_v50 = vsel %vm178_vm3, %v415_v42, %v175_v48 }
 0x1aa   :  { %v184_v51 = vsel %vm181_vm4, %v183_v49, %v179_v50 }
 0x1ab   :  { %v185_v52 = vmul.f32 %v413_v23, %v184_v51 }
 0x1ad   :  { %v186_v53 = vpack.c.bf16 %v185_v52, %v185_v52 }
 0x1af   :  { %259 = vmatmul.bf16.vlgmr.msra.gmra.mxu2 %v186_v53 }
 0x232   :  { %v260_v59 = vpop.f32.mrf.mxu2 }
 0x233   :  { %v268_v60 = vmul.f32 %v267_v57, %v260_v59 }
 0x235   :  { %v271_v62 = vadd.f32 %v270_v58, %v268_v60 }
 0x237   :  { %v273_v63 = vadd.f32 %v272_v61, %v271_v62 }
 0x239   :  { %v274_v0 = vsub.f32 0.0, %v273_v63 }
 0x23a   :  { %v262_v1 = vpop.f32.mrf.mxu2 }
 0x23b   :  { %v275_v2 = vmul.f32 1.442695, %v274_v0 }
 0x23d   :  { %416 = vpow2.f32 %v275_v2 }
 0x243   :  { %v417_v3 = vpop.eup %416 }
 0x244   :  { %v277_v4 = vadd.f32 1.0, %v417_v3 }
 0x246   :  { %418 = vrcp.f32 %v277_v4  ;;  %v289_v8 = vand.u32 2147483648, %v277_v4  ;;  %v287_v11 = vand.u32 2147483647, %v277_v4  ;;  %vm283_vm6 = vweird.f32 %v277_v4 }
 0x248   :  { %v290_v13 = vor.u32 1.1754944e-38, %v289_v8  ;;  %vm288_vm8 = vcmp.eq.f32.partialorder %v287_v11, 8.507059e+37 }
 0x24c   :  { %v419_v5 = vpop.eup %418 }
 0x24d   :  { %v279_v6 = vmul.f32 %v419_v5, %v277_v4  ;;  %vm284_vm5 = vweird.f32 %v419_v5 }
 0x24e   :  { %vm285_vm7 = vmor %vm283_vm6, %vm284_vm5 }
 0x24f   :  { %v280_v7 = vsub.f32 1.0, %v279_v6 }
 0x251   :  { %v281_v10 = vmul.f32 %v419_v5, %v280_v7 }
 0x253   :  { %v282_v12 = vadd.f32 %v419_v5, %v281_v10 }
 0x255   :  { %v286_v15 = vsel %vm285_vm7, %v419_v5, %v282_v12 }
 0x256   :  { %v291_v16 = vsel %vm288_vm8, %v290_v13, %v286_v15 }
 0x257   :  { %v292_v17 = vmax.f32 %v291_v16, 1e-05 }
 0x259   :  { %v293_v18 = vmin.f32 %v292_v17, 0.99999 }
 0x25b   :  { %v297_v19 = vsel %vm296_vm9, %v271_v62, %v293_v18 }
 0x25c   :  { %298 = vst [vmem:[#allocation10] sm:$0xff] %v297_v19 }
 0x25d   :  { %309 = dma.vmem_to_hbm [thread:$0]  %s305_s17, 128, %s307_s20, [#allocation4]  }
 0x25e   :  { %534 = dma.done.wait [#allocation4], 128  }
 0x25f   :  { %535 = vsyncadd [#allocation4], 4294967168 }
 0x260   :  { %314 = vsyncpa [#allocation3], 1 }
 0x261   :  { %315 = vsyncpa [#allocation7], 1 }
 0x262   :  { %316 = vsyncpa [#allocation4], 1 }
 0x263   :  { %317 = vsyncpa [#allocation5], 1 }

</bundles_post_ra>
